<compile_context>
chip_gen: v5e
topology: v5e:2x2
jax: 0.10.0
libtpu: 0.0.40
codegen_flags: <defaults>
</compile_context>

<pallas_src>
import functools

import jax
import jax.numpy as jnp
import numpy as np
from jax.experimental import pallas as pl
from jax.experimental.pallas import tpu as pltpu

EPS = 1e-5


# --------------------------- weight / BN folding --------------------------- #

def _fold_conv3x3(w, w_in, w_out, stride, cin, cout):
    """Fold a (3,3,Cin,Cout) conv weight into 3 'shift' matmul weights.

    Returns (3, w_in*cin, w_out*cout) with
        big[ky][jj*cin + c, j*cout + o] = w[ky, kx, c, o],  jj = stride*j + kx - 1,
    out-of-range jj dropped (== zero padding along W).  The conv over W (incl.
    padding and stride) then becomes   out_rows += x_rows @ big[ky]   per ky tap.
    """
    j = np.arange(w_out)
    mats = []
    for ky in range(3):
        m = jnp.zeros((w_in * cin, w_out * cout), jnp.float32)
        for kx in range(3):
            jj = stride * j + kx - 1
            ok = (jj >= 0) & (jj < w_in)
            sel = np.zeros((w_in, w_out), np.float32)
            sel[jj[ok], j[ok]] = 1.0
            m = m + jnp.kron(jnp.asarray(sel), w[ky, kx].astype(jnp.float32))
        mats.append(m)
    return jnp.stack(mats)


def _fold_conv1x1(w, w_in, w_out, stride, cin, cout):
    """(Cin,Cout) 1x1 conv (with stride along W) -> (w_in*cin, w_out*cout)."""
    j = np.arange(w_out)
    sel = np.zeros((w_in, w_out), np.float32)
    sel[stride * j, j] = 1.0
    return jnp.kron(jnp.asarray(sel), w.astype(jnp.float32))


def _fold_bn(gamma, beta, mean, var, conv_bias, w_out, cout):
    """Eval-mode BN (+conv bias) -> lane-dense scale/bias of shape (1, w_out*cout)."""
    s = gamma / jnp.sqrt(var + EPS)
    b = beta + (conv_bias - mean) * s
    return (jnp.tile(s, w_out).reshape(1, w_out * cout).astype(jnp.float32),
            jnp.tile(b, w_out).reshape(1, w_out * cout).astype(jnp.float32))


# ------------------------------ fused kernel ------------------------------- #

def _resblock_kernel(x_ref, w1_ref, s1_ref, b1_ref, w2_ref, s2_ref, b2_ref,
                     *rest, H, W, Cin, Cout, Ho, Wo, stride, projection, cdt):
    if projection:
        wsc_ref, ssc_ref, bsc_ref, o_ref, xp_ref, hp_ref = rest
    else:
        o_ref, xp_ref, hp_ref = rest

    # Stage x into an H-halo'ed, lane-flattened f32 VMEM scratch (in-kernel
    # zero padding: rows 0 and H+1 stay zero; the W halo lives in the weights).
    xp_ref[...] = jnp.zeros_like(xp_ref)
    xp_ref[pl.ds(1, H), :] = x_ref[0].astype(xp_ref.dtype)

    def rows(ref, start, n):
        if stride == 1:
            return ref[pl.ds(start, n), :]
        return ref[pl.ds(start, n, stride), :]      # strided sublane read

    # conv1 (3x3, stride) + bn1 + relu  ->  lane-dense (Ho, Wo*Cout) f32
    acc = jnp.zeros((Ho, Wo * Cout), jnp.float32)
    for ky in range(3):
        acc += jnp.dot(rows(xp_ref, ky, Ho).astype(cdt), w1_ref[ky],
                       preferred_element_type=jnp.float32)
    h = jnp.maximum(acc * s1_ref[...] + b1_ref[...], 0.0)

    # Stage h (H-halo'ed) for conv2 -- never leaves VMEM.
    hp_ref[...] = jnp.zeros_like(hp_ref)
    hp_ref[pl.ds(1, Ho), :] = h

    # Shortcut, computed from the x tile already resident in VMEM.
    if projection:
        sc = jnp.dot(rows(xp_ref, 1, Ho).astype(cdt), wsc_ref[...],
                     preferred_element_type=jnp.float32)
        sc = sc * ssc_ref[...] + bsc_ref[...]
    else:
        sc = xp_ref[pl.ds(1, Ho), :]

    # conv2 (3x3, stride 1) + bn2 + residual add + relu
    acc2 = jnp.zeros((Ho, Wo * Cout), jnp.float32)
    for ky in range(3):
        acc2 += jnp.dot(hp_ref[pl.ds(ky, Ho), :].astype(cdt), w2_ref[ky],
                        preferred_element_type=jnp.float32)
    out = jnp.maximum(acc2 * s2_ref[...] + b2_ref[...] + sc, 0.0)
    o_ref[0] = out.astype(o_ref.dtype)


# -------------------------------- wrapper ----------------------------------- #

def residual_block_pallas(x, p, *, stride=1, compute_dtype=jnp.bfloat16):
    """Fused ResidualBlock forward.  x: (N, H, W, Cin) NHWC float32."""
    N, H, W, Cin = x.shape
    Cout = p["w1"].shape[-1]
    assert stride in (1, 2) and H % stride == 0 and W % stride == 0
    Ho, Wo = H // stride, W // stride
    projection = (stride != 1) or (Cin != Cout)
    cdt = jnp.dtype(compute_dtype)

    # Fold conv weights (W-padding + stride baked in) and eval-mode BN params.
    w1 = _fold_conv3x3(p["w1"], W, Wo, stride, Cin, Cout).astype(cdt)
    w2 = _fold_conv3x3(p["w2"], Wo, Wo, 1, Cout, Cout).astype(cdt)
    s1, b1 = _fold_bn(p["g1"], p["be1"], p["m1"], p["v1"], p["b1"], Wo, Cout)
    s2, b2 = _fold_bn(p["g2"], p["be2"], p["m2"], p["v2"], p["b2"], Wo, Cout)

    # Lane-flattened view of x (free, contiguous); bf16 halves the HBM read.
    x2 = x.reshape(N, H, W * Cin).astype(cdt)

    args = [x2, w1, s1, b1, w2, s2, b2]
    in_specs = [
        pl.BlockSpec((1, H, W * Cin), lambda n: (n, 0, 0)),
        pl.BlockSpec((3, W * Cin, Wo * Cout), lambda n: (0, 0, 0)),
        pl.BlockSpec((1, Wo * Cout), lambda n: (0, 0)),
        pl.BlockSpec((1, Wo * Cout), lambda n: (0, 0)),
        pl.BlockSpec((3, Wo * Cout, Wo * Cout), lambda n: (0, 0, 0)),
        pl.BlockSpec((1, Wo * Cout), lambda n: (0, 0)),
        pl.BlockSpec((1, Wo * Cout), lambda n: (0, 0)),
    ]
    if projection:
        wsc = _fold_conv1x1(p["wsc"], W, Wo, stride, Cin, Cout).astype(cdt)
        ssc, bsc = _fold_bn(p["gsc"], p["besc"], p["msc"], p["vsc"], p["bsc"],
                            Wo, Cout)
        args += [wsc, ssc, bsc]
        in_specs += [
            pl.BlockSpec((W * Cin, Wo * Cout), lambda n: (0, 0)),
            pl.BlockSpec((1, Wo * Cout), lambda n: (0, 0)),
            pl.BlockSpec((1, Wo * Cout), lambda n: (0, 0)),
        ]

    kernel = functools.partial(
        _resblock_kernel, H=H, W=W, Cin=Cin, Cout=Cout, Ho=Ho, Wo=Wo,
        stride=stride, projection=projection, cdt=cdt)

    out = pl.pallas_call(
        kernel,
        out_shape=jax.ShapeDtypeStruct((N, Ho, Wo * Cout), jnp.float32),
        grid=(N,),                                     # one image per grid step
        in_specs=in_specs,
        out_specs=pl.BlockSpec((1, Ho, Wo * Cout), lambda n: (n, 0, 0)),
        scratch_shapes=[pltpu.VMEM((H + 2, W * Cin), jnp.float32),      # x + halo
                        pltpu.VMEM((Ho + 2, Wo * Cout), jnp.float32)],  # h + halo
        compiler_params=pltpu.CompilerParams(dimension_semantics=("parallel",)),
    )(*args)
    return out.reshape(N, Ho, Wo, Cout)                # free metadata reshape


# ------------------------- pure-JAX reference ------------------------------ #

def residual_block_ref(x, p, *, stride=1):
    dn = ("NHWC", "HWIO", "NHWC")

    def bn(y, g, b, m, v):
        return g * (y - m) / jnp.sqrt(v + EPS) + b

    h = jax.lax.conv_general_dilated(x, p["w1"], (stride, stride),
                                     ((1, 1), (1, 1)), dimension_numbers=dn) + p["b1"]
    h = jax.nn.relu(bn(h, p["g1"], p["be1"], p["m1"], p["v1"]))
    o = jax.lax.conv_general_dilated(h, p["w2"], (1, 1),
                                     ((1, 1), (1, 1)), dimension_numbers=dn) + p["b2"]
    o = bn(o, p["g2"], p["be2"], p["m2"], p["v2"])
    in_c, out_c = x.shape[-1], p["w1"].shape[-1]
    if stride != 1 or in_c != out_c:
        wsc = p["wsc"].reshape(1, 1, in_c, out_c)
        sc = jax.lax.conv_general_dilated(x, wsc, (stride, stride),
                                          ((0, 0), (0, 0)), dimension_numbers=dn) + p["bsc"]
        sc = bn(sc, p["gsc"], p["besc"], p["msc"], p["vsc"])
    else:
        sc = x
    return jax.nn.relu(o + sc)


# --------------------------------- main ------------------------------------ #

if __name__ == "__main__":
    N, Cin, Cout, H, W = 2, 4, 8, 16, 16
    stride = 1          # Cin != Cout -> projection shortcut path is exercised

    key = jax.random.PRNGKey(0)
    ks = jax.random.split(key, 20)

    def nrm(k, shape, s=0.1):
        return s * jax.random.normal(k, shape, jnp.float32)

    params = dict(
        # conv1 / bn1
        w1=nrm(ks[0], (3, 3, Cin, Cout)), b1=nrm(ks[1], (Cout,)),
        g1=1.0 + nrm(ks[2], (Cout,)), be1=nrm(ks[3], (Cout,)),
        m1=nrm(ks[4], (Cout,)),
        v1=jax.random.uniform(ks[5], (Cout,), jnp.float32, 0.5, 1.5),
        # conv2 / bn2
        w2=nrm(ks[6], (3, 3, Cout, Cout)), b2=nrm(ks[7], (Cout,)),
        g2=1.0 + nrm(ks[8], (Cout,)), be2=nrm(ks[9], (Cout,)),
        m2=nrm(ks[10], (Cout,)),
        v2=jax.random.uniform(ks[11], (Cout,), jnp.float32, 0.5, 1.5),
        # shortcut 1x1 conv / bn
        wsc=nrm(ks[12], (Cin, Cout)), bsc=nrm(ks[13], (Cout,)),
        gsc=1.0 + nrm(ks[14], (Cout,)), besc=nrm(ks[15], (Cout,)),
        msc=nrm(ks[16], (Cout,)),
        vsc=jax.random.uniform(ks[17], (Cout,), jnp.float32, 0.5, 1.5),
    )

    x = jax.random.normal(ks[18], (N, H, W, Cin), jnp.float32)  # NHWC (== NCHW [2,4,16,16])

    ref = residual_block_ref(x, params, stride=stride)

    # Strict f32 check.
    out32 = jax.block_until_ready(
        residual_block_pallas(x, params, stride=stride, compute_dtype=jnp.float32))
    assert out32.shape == (N, H // stride, W // stride, Cout)
    np.testing.assert_allclose(np.asarray(out32), np.asarray(ref), atol=1e-4, rtol=1e-4)

    # bf16 MXU path (f32 accumulation + f32 epilogue): looser tolerance.
    outbf = jax.block_until_ready(
        residual_block_pallas(x, params, stride=stride, compute_dtype=jnp.bfloat16))
    np.testing.assert_allclose(np.asarray(outbf), np.asarray(ref), atol=5e-2, rtol=5e-2)

    print("KERNEL_OK")
</pallas_src>

<mosaic_0001>
module attributes {stable_mosaic.version = 11 : i64} {
  func.func @_resblock_kernel(%arg0: i32, %arg1: memref<1x16x64xf32, #tpu.memory_space<vmem>>, %arg2: memref<3x64x128xf32, #tpu.memory_space<vmem>>, %arg3: memref<1x128xf32, #tpu.memory_space<vmem>>, %arg4: memref<1x128xf32, #tpu.memory_space<vmem>>, %arg5: memref<3x128x128xf32, #tpu.memory_space<vmem>>, %arg6: memref<1x128xf32, #tpu.memory_space<vmem>>, %arg7: memref<1x128xf32, #tpu.memory_space<vmem>>, %arg8: memref<64x128xf32, #tpu.memory_space<vmem>>, %arg9: memref<1x128xf32, #tpu.memory_space<vmem>>, %arg10: memref<1x128xf32, #tpu.memory_space<vmem>>, %arg11: memref<1x16x128xf32, #tpu.memory_space<vmem>>, %arg12: memref<18x64xf32, #tpu.memory_space<vmem>>, %arg13: memref<18x128xf32, #tpu.memory_space<vmem>>) attributes {dimension_semantics = [#tpu.dimension_semantics<parallel>], iteration_bounds = array<i64: 2>, scalar_prefetch = 0 : i64, scratch_operands = 2 : i64, tpu.core_type = #tpu.core_type<tc>, window_params = [{transform_indices = @transform_0, window_bounds = array<i64: 1, 16, 64>}, {pipeline_mode = #tpu.pipeline_mode<synchronous>, transform_indices = @transform_1, window_bounds = array<i64: 3, 64, 128>}, {pipeline_mode = #tpu.pipeline_mode<synchronous>, transform_indices = @transform_2, window_bounds = array<i64: 1, 128>}, {pipeline_mode = #tpu.pipeline_mode<synchronous>, transform_indices = @transform_3, window_bounds = array<i64: 1, 128>}, {pipeline_mode = #tpu.pipeline_mode<synchronous>, transform_indices = @transform_4, window_bounds = array<i64: 3, 128, 128>}, {pipeline_mode = #tpu.pipeline_mode<synchronous>, transform_indices = @transform_5, window_bounds = array<i64: 1, 128>}, {pipeline_mode = #tpu.pipeline_mode<synchronous>, transform_indices = @transform_6, window_bounds = array<i64: 1, 128>}, {pipeline_mode = #tpu.pipeline_mode<synchronous>, transform_indices = @transform_7, window_bounds = array<i64: 64, 128>}, {pipeline_mode = #tpu.pipeline_mode<synchronous>, transform_indices = @transform_8, window_bounds = array<i64: 1, 128>}, {pipeline_mode = #tpu.pipeline_mode<synchronous>, transform_indices = @transform_9, window_bounds = array<i64: 1, 128>}, {transform_indices = @transform_10, window_bounds = array<i64: 1, 16, 128>}]} {
    %cst = arith.constant 0.000000e+00 : f32
    %0 = vector.broadcast %cst : f32 to vector<18x64xf32>
    %c0 = arith.constant 0 : index
    %c0_0 = arith.constant 0 : index
    %1 = vector.load %arg12[%c0, %c0_0] : memref<18x64xf32, #tpu.memory_space<vmem>>, vector<18x64xf32>
    tpu.vector_store %arg12[%c0, %c0_0], %0 {strides = array<i32>} : memref<18x64xf32, #tpu.memory_space<vmem>>, vector<18x64xf32>,
    %c0_1 = arith.constant 0 : index
    %c0_2 = arith.constant 0 : index
    %c0_3 = arith.constant 0 : index
    %2 = vector.load %arg1[%c0_1, %c0_2, %c0_3] : memref<1x16x64xf32, #tpu.memory_space<vmem>>, vector<1x16x64xf32>
    %3 = vector.shape_cast %2 : vector<1x16x64xf32> to vector<16x64xf32>
    %c1 = arith.constant 1 : index
    %c0_4 = arith.constant 0 : index
    %4 = vector.load %arg12[%c1, %c0_4] : memref<18x64xf32, #tpu.memory_space<vmem>>, vector<16x64xf32>
    tpu.vector_store %arg12[%c1, %c0_4], %3 {strides = array<i32>} : memref<18x64xf32, #tpu.memory_space<vmem>>, vector<16x64xf32>,
    %cst_5 = arith.constant 0.000000e+00 : f32
    %5 = vector.broadcast %cst_5 : f32 to vector<16x128xf32>
    %c0_6 = arith.constant 0 : index
    %c0_7 = arith.constant 0 : index
    %6 = vector.load %arg12[%c0_6, %c0_7] : memref<18x64xf32, #tpu.memory_space<vmem>>, vector<16x64xf32>
    %c0_8 = arith.constant 0 : index
    %c0_9 = arith.constant 0 : index
    %c0_10 = arith.constant 0 : index
    %7 = vector.load %arg2[%c0_8, %c0_9, %c0_10] : memref<3x64x128xf32, #tpu.memory_space<vmem>>, vector<1x64x128xf32>
    %8 = vector.shape_cast %7 : vector<1x64x128xf32> to vector<64x128xf32>
    %cst_11 = arith.constant dense<0.000000e+00> : vector<16x128xf32>
    %9 = tpu.matmul %6, %8, %cst_11 {dimension_numbers = #tpu.dot_dimension_numbers<[1], [0], [0], [1], [0, 0, 1, 1], [], []>} : vector<16x64xf32>, vector<64x128xf32>, vector<16x128xf32> -> vector<16x128xf32>
    %10 = arith.addf %5, %9 : vector<16x128xf32>
    %c1_12 = arith.constant 1 : index
    %c0_13 = arith.constant 0 : index
    %11 = vector.load %arg12[%c1_12, %c0_13] : memref<18x64xf32, #tpu.memory_space<vmem>>, vector<16x64xf32>
    %c1_14 = arith.constant 1 : index
    %c0_15 = arith.constant 0 : index
    %c0_16 = arith.constant 0 : index
    %12 = vector.load %arg2[%c1_14, %c0_15, %c0_16] : memref<3x64x128xf32, #tpu.memory_space<vmem>>, vector<1x64x128xf32>
    %13 = vector.shape_cast %12 : vector<1x64x128xf32> to vector<64x128xf32>
    %cst_17 = arith.constant dense<0.000000e+00> : vector<16x128xf32>
    %14 = tpu.matmul %11, %13, %cst_17 {dimension_numbers = #tpu.dot_dimension_numbers<[1], [0], [0], [1], [0, 0, 1, 1], [], []>} : vector<16x64xf32>, vector<64x128xf32>, vector<16x128xf32> -> vector<16x128xf32>
    %15 = arith.addf %10, %14 : vector<16x128xf32>
    %c2 = arith.constant 2 : index
    %c0_18 = arith.constant 0 : index
    %16 = vector.load %arg12[%c2, %c0_18] : memref<18x64xf32, #tpu.memory_space<vmem>>, vector<16x64xf32>
    %c2_19 = arith.constant 2 : index
    %c0_20 = arith.constant 0 : index
    %c0_21 = arith.constant 0 : index
    %17 = vector.load %arg2[%c2_19, %c0_20, %c0_21] : memref<3x64x128xf32, #tpu.memory_space<vmem>>, vector<1x64x128xf32>
    %18 = vector.shape_cast %17 : vector<1x64x128xf32> to vector<64x128xf32>
    %cst_22 = arith.constant dense<0.000000e+00> : vector<16x128xf32>
    %19 = tpu.matmul %16, %18, %cst_22 {dimension_numbers = #tpu.dot_dimension_numbers<[1], [0], [0], [1], [0, 0, 1, 1], [], []>} : vector<16x64xf32>, vector<64x128xf32>, vector<16x128xf32> -> vector<16x128xf32>
    %20 = arith.addf %15, %19 : vector<16x128xf32>
    %c0_23 = arith.constant 0 : index
    %c0_24 = arith.constant 0 : index
    %21 = vector.load %arg3[%c0_23, %c0_24] : memref<1x128xf32, #tpu.memory_space<vmem>>, vector<1x128xf32>
    %22 = vector.broadcast %21 : vector<1x128xf32> to vector<16x128xf32>
    %23 = arith.mulf %20, %22 : vector<16x128xf32>
    %c0_25 = arith.constant 0 : index
    %c0_26 = arith.constant 0 : index
    %24 = vector.load %arg4[%c0_25, %c0_26] : memref<1x128xf32, #tpu.memory_space<vmem>>, vector<1x128xf32>
    %25 = vector.broadcast %24 : vector<1x128xf32> to vector<16x128xf32>
    %26 = arith.addf %23, %25 : vector<16x128xf32>
    %cst_27 = arith.constant 0.000000e+00 : f32
    %27 = vector.broadcast %cst_27 : f32 to vector<16x128xf32>
    %28 = arith.maximumf %26, %27 : vector<16x128xf32>
    %cst_28 = arith.constant 0.000000e+00 : f32
    %29 = vector.broadcast %cst_28 : f32 to vector<18x128xf32>
    %c0_29 = arith.constant 0 : index
    %c0_30 = arith.constant 0 : index
    %30 = vector.load %arg13[%c0_29, %c0_30] : memref<18x128xf32, #tpu.memory_space<vmem>>, vector<18x128xf32>
    tpu.vector_store %arg13[%c0_29, %c0_30], %29 {strides = array<i32>} : memref<18x128xf32, #tpu.memory_space<vmem>>, vector<18x128xf32>,
    %c1_31 = arith.constant 1 : index
    %c0_32 = arith.constant 0 : index
    %31 = vector.load %arg13[%c1_31, %c0_32] : memref<18x128xf32, #tpu.memory_space<vmem>>, vector<16x128xf32>
    tpu.vector_store %arg13[%c1_31, %c0_32], %28 {strides = array<i32>} : memref<18x128xf32, #tpu.memory_space<vmem>>, vector<16x128xf32>,
    %c1_33 = arith.constant 1 : index
    %c0_34 = arith.constant 0 : index
    %32 = vector.load %arg12[%c1_33, %c0_34] : memref<18x64xf32, #tpu.memory_space<vmem>>, vector<16x64xf32>
    %c0_35 = arith.constant 0 : index
    %c0_36 = arith.constant 0 : index
    %33 = vector.load %arg8[%c0_35, %c0_36] : memref<64x128xf32, #tpu.memory_space<vmem>>, vector<64x128xf32>
    %cst_37 = arith.constant dense<0.000000e+00> : vector<16x128xf32>
    %34 = tpu.matmul %32, %33, %cst_37 {dimension_numbers = #tpu.dot_dimension_numbers<[1], [0], [0], [1], [0, 0, 1, 1], [], []>} : vector<16x64xf32>, vector<64x128xf32>, vector<16x128xf32> -> vector<16x128xf32>
    %c0_38 = arith.constant 0 : index
    %c0_39 = arith.constant 0 : index
    %35 = vector.load %arg9[%c0_38, %c0_39] : memref<1x128xf32, #tpu.memory_space<vmem>>, vector<1x128xf32>
    %36 = vector.broadcast %35 : vector<1x128xf32> to vector<16x128xf32>
    %37 = arith.mulf %34, %36 : vector<16x128xf32>
    %c0_40 = arith.constant 0 : index
    %c0_41 = arith.constant 0 : index
    %38 = vector.load %arg10[%c0_40, %c0_41] : memref<1x128xf32, #tpu.memory_space<vmem>>, vector<1x128xf32>
    %39 = vector.broadcast %38 : vector<1x128xf32> to vector<16x128xf32>
    %40 = arith.addf %37, %39 : vector<16x128xf32>
    %cst_42 = arith.constant 0.000000e+00 : f32
    %41 = vector.broadcast %cst_42 : f32 to vector<16x128xf32>
    %c0_43 = arith.constant 0 : index
    %c0_44 = arith.constant 0 : index
    %42 = vector.load %arg13[%c0_43, %c0_44] : memref<18x128xf32, #tpu.memory_space<vmem>>, vector<16x128xf32>
    %c0_45 = arith.constant 0 : index
    %c0_46 = arith.constant 0 : index
    %c0_47 = arith.constant 0 : index
    %43 = vector.load %arg5[%c0_45, %c0_46, %c0_47] : memref<3x128x128xf32, #tpu.memory_space<vmem>>, vector<1x128x128xf32>
    %44 = vector.shape_cast %43 : vector<1x128x128xf32> to vector<128x128xf32>
    %cst_48 = arith.constant dense<0.000000e+00> : vector<16x128xf32>
    %45 = tpu.matmul %42, %44, %cst_48 {dimension_numbers = #tpu.dot_dimension_numbers<[1], [0], [0], [1], [0, 0, 1, 1], [], []>} : vector<16x128xf32>, vector<128x128xf32>, vector<16x128xf32> -> vector<16x128xf32>
    %46 = arith.addf %41, %45 : vector<16x128xf32>
    %c1_49 = arith.constant 1 : index
    %c0_50 = arith.constant 0 : index
    %47 = vector.load %arg13[%c1_49, %c0_50] : memref<18x128xf32, #tpu.memory_space<vmem>>, vector<16x128xf32>
    %c1_51 = arith.constant 1 : index
    %c0_52 = arith.constant 0 : index
    %c0_53 = arith.constant 0 : index
    %48 = vector.load %arg5[%c1_51, %c0_52, %c0_53] : memref<3x128x128xf32, #tpu.memory_space<vmem>>, vector<1x128x128xf32>
    %49 = vector.shape_cast %48 : vector<1x128x128xf32> to vector<128x128xf32>
    %cst_54 = arith.constant dense<0.000000e+00> : vector<16x128xf32>
    %50 = tpu.matmul %47, %49, %cst_54 {dimension_numbers = #tpu.dot_dimension_numbers<[1], [0], [0], [1], [0, 0, 1, 1], [], []>} : vector<16x128xf32>, vector<128x128xf32>, vector<16x128xf32> -> vector<16x128xf32>
    %51 = arith.addf %46, %50 : vector<16x128xf32>
    %c2_55 = arith.constant 2 : index
    %c0_56 = arith.constant 0 : index
    %52 = vector.load %arg13[%c2_55, %c0_56] : memref<18x128xf32, #tpu.memory_space<vmem>>, vector<16x128xf32>
    %c2_57 = arith.constant 2 : index
    %c0_58 = arith.constant 0 : index
    %c0_59 = arith.constant 0 : index
    %53 = vector.load %arg5[%c2_57, %c0_58, %c0_59] : memref<3x128x128xf32, #tpu.memory_space<vmem>>, vector<1x128x128xf32>
    %54 = vector.shape_cast %53 : vector<1x128x128xf32> to vector<128x128xf32>
    %cst_60 = arith.constant dense<0.000000e+00> : vector<16x128xf32>
    %55 = tpu.matmul %52, %54, %cst_60 {dimension_numbers = #tpu.dot_dimension_numbers<[1], [0], [0], [1], [0, 0, 1, 1], [], []>} : vector<16x128xf32>, vector<128x128xf32>, vector<16x128xf32> -> vector<16x128xf32>
    %56 = arith.addf %51, %55 : vector<16x128xf32>
    %c0_61 = arith.constant 0 : index
    %c0_62 = arith.constant 0 : index
    %57 = vector.load %arg6[%c0_61, %c0_62] : memref<1x128xf32, #tpu.memory_space<vmem>>, vector<1x128xf32>
    %58 = vector.broadcast %57 : vector<1x128xf32> to vector<16x128xf32>
    %59 = arith.mulf %56, %58 : vector<16x128xf32>
    %c0_63 = arith.constant 0 : index
    %c0_64 = arith.constant 0 : index
    %60 = vector.load %arg7[%c0_63, %c0_64] : memref<1x128xf32, #tpu.memory_space<vmem>>, vector<1x128xf32>
    %61 = vector.broadcast %60 : vector<1x128xf32> to vector<16x128xf32>
    %62 = arith.addf %59, %61 : vector<16x128xf32>
    %63 = arith.addf %62, %40 : vector<16x128xf32>
    %cst_65 = arith.constant 0.000000e+00 : f32
    %64 = vector.broadcast %cst_65 : f32 to vector<16x128xf32>
    %65 = arith.maximumf %63, %64 : vector<16x128xf32>
    %c0_66 = arith.constant 0 : index
    %c0_67 = arith.constant 0 : index
    %c0_68 = arith.constant 0 : index
    %66 = vector.load %arg11[%c0_66, %c0_67, %c0_68] : memref<1x16x128xf32, #tpu.memory_space<vmem>>, vector<1x16x128xf32>
    %67 = vector.shape_cast %66 : vector<1x16x128xf32> to vector<16x128xf32>
    %68 = vector.shape_cast %65 : vector<16x128xf32> to vector<1x16x128xf32>
    tpu.vector_store %arg11[%c0_66, %c0_67, %c0_68], %68 {strides = array<i32>} : memref<1x16x128xf32, #tpu.memory_space<vmem>>, vector<1x16x128xf32>,
    return
  }
  func.func @transform_0(%arg0: i32) -> (i32, i32, i32) {
    %c0_i32 = arith.constant 0 : i32
    %c0_i32_0 = arith.constant 0 : i32
    %c0_i32_1 = arith.constant 0 : i32
    return %arg0, %c0_i32, %c0_i32_0 : i32, i32, i32
  }
  func.func @transform_1(%arg0: i32) -> (i32, i32, i32) {
    %c0_i32 = arith.constant 0 : i32
    %c0_i32_0 = arith.constant 0 : i32
    %c0_i32_1 = arith.constant 0 : i32
    %c0_i32_2 = arith.constant 0 : i32
    return %c0_i32, %c0_i32_0, %c0_i32_1 : i32, i32, i32
  }
  func.func @transform_2(%arg0: i32) -> (i32, i32) {
    %c0_i32 = arith.constant 0 : i32
    %c0_i32_0 = arith.constant 0 : i32
    %c0_i32_1 = arith.constant 0 : i32
    return %c0_i32, %c0_i32_0 : i32, i32
  }
  func.func @transform_3(%arg0: i32) -> (i32, i32) {
    %c0_i32 = arith.constant 0 : i32
    %c0_i32_0 = arith.constant 0 : i32
    %c0_i32_1 = arith.constant 0 : i32
    return %c0_i32, %c0_i32_0 : i32, i32
  }
  func.func @transform_4(%arg0: i32) -> (i32, i32, i32) {
    %c0_i32 = arith.constant 0 : i32
    %c0_i32_0 = arith.constant 0 : i32
    %c0_i32_1 = arith.constant 0 : i32
    %c0_i32_2 = arith.constant 0 : i32
    return %c0_i32, %c0_i32_0, %c0_i32_1 : i32, i32, i32
  }
  func.func @transform_5(%arg0: i32) -> (i32, i32) {
    %c0_i32 = arith.constant 0 : i32
    %c0_i32_0 = arith.constant 0 : i32
    %c0_i32_1 = arith.constant 0 : i32
    return %c0_i32, %c0_i32_0 : i32, i32
  }
  func.func @transform_6(%arg0: i32) -> (i32, i32) {
    %c0_i32 = arith.constant 0 : i32
    %c0_i32_0 = arith.constant 0 : i32
    %c0_i32_1 = arith.constant 0 : i32
    return %c0_i32, %c0_i32_0 : i32, i32
  }
  func.func @transform_7(%arg0: i32) -> (i32, i32) {
    %c0_i32 = arith.constant 0 : i32
    %c0_i32_0 = arith.constant 0 : i32
    %c0_i32_1 = arith.constant 0 : i32
    return %c0_i32, %c0_i32_0 : i32, i32
  }
  func.func @transform_8(%arg0: i32) -> (i32, i32) {
    %c0_i32 = arith.constant 0 : i32
    %c0_i32_0 = arith.constant 0 : i32
    %c0_i32_1 = arith.constant 0 : i32
    return %c0_i32, %c0_i32_0 : i32, i32
  }
  func.func @transform_9(%arg0: i32) -> (i32, i32) {
    %c0_i32 = arith.constant 0 : i32
    %c0_i32_0 = arith.constant 0 : i32
    %c0_i32_1 = arith.constant 0 : i32
    return %c0_i32, %c0_i32_0 : i32, i32
  }
  func.func @transform_10(%arg0: i32) -> (i32, i32, i32) {
    %c0_i32 = arith.constant 0 : i32
    %c0_i32_0 = arith.constant 0 : i32
    %c0_i32_1 = arith.constant 0 : i32
    return %arg0, %c0_i32, %c0_i32_0 : i32, i32, i32
  }
}

</mosaic_0001>

<bundles_post_ra>
// kernel: tpu_custom_call.1
= control target key start
LH: loop header
LB: loop body
LE: loop exit
PB: predicated region body
PF: predicated region fallthrough
CT: control target
= control target key end

     0   :  { %s1486_s0 = inlined_call_operand.hbm [shape: f32[2,16,64], index: 0, kind: input, shape index: {}]   ;;  %s1487_s1 = inlined_call_operand.hbm [shape: f32[3,64,128], index: 1, kind: input, shape index: {}]   ;;  %s1488_s2 = inlined_call_operand.vmem [shape: f32[1,128], index: 2, kind: input, shape index: {}]   ;;  %s1489_s3 = inlined_call_operand.vmem [shape: f32[1,128], index: 3, kind: input, shape index: {}]   ;;  %s1490_s4 = inlined_call_operand.hbm [shape: f32[3,128,128], index: 4, kind: input, shape index: {}]   ;;  %s1491_s5 = inlined_call_operand.vmem [shape: f32[1,128], index: 5, kind: input, shape index: {}]   ;;  %s1492_s6 = inlined_call_operand.vmem [shape: f32[1,128], index: 6, kind: input, shape index: {}]   ;;  %s1493_s7 = inlined_call_operand.hbm [shape: f32[64,128], index: 7, kind: input, shape index: {}]   ;;  %s1494_s8 = inlined_call_operand.vmem [shape: f32[1,128], index: 8, kind: input, shape index: {}]   ;;  %s1495_s9 = inlined_call_operand.vmem [shape: f32[1,128], index: 9, kind: input, shape index: {}]   ;;  %s1496_s10 = inlined_call_operand.hbm [shape: f32[2,16,128], index: 10, kind: output, shape index: {}]  }
   0x1   :  { %1499 = sst [smem:[#allocation18_spill]] %s1487_s1 }
   0x2   :  { %1500 = sst [smem:[#allocation19_spill]] %s1490_s4 }
   0x3   :  { %1501 = sst [smem:[#allocation20_spill]] %s1493_s7 }
   0x4   :  { %15 = vsyncpa [#allocation5], 0 }
   0x5   :  { %17 = vsyncpa [#allocation5 + $0x1], 0 }
   0x6   :  { %18 = vsyncpa [#allocation8], 0 }
   0x7   :  { %19 = vsyncpa [#allocation11], 0 }
   0x8   :  { %20 = vsyncpa [#allocation6], 0 }
   0x9   :  { %22 = vsyncpa [#allocation6 + $0x1], 0  ;;  %s1270_s13 = smov 0   ;;  %s1272_s14 = smov 0  }
   0xa   :  { %s1274_s15 = smov 0   ;;  %s1276_s16 = smov 0  }
   0xb LB: > { %s1291_s17 = sadd.s32 4294967295, %s1205_s16   ;;  %s893_s18 = sadd.s32 4294967294, %s1205_s16   ;;  %s1205_s16 = sphi %s1276_s16, %s1519_s16   ;;  %s1201_s15 = sphi %s1274_s15, %s1518_s15   ;;  %s1197_s14 = sphi %s1272_s14, %s1517_s14   ;;  %s1193_s13 = sphi %s1270_s13, %s1516_s13  }
   0xc   : > { %p48_p0 = scmp.ne.s32.totalorder %s1197_s14, %s1193_s13  ;;  %p49_p1 = scmp.eq.s32.totalorder %s1291_s17, 0 }
   0xd   : > { %p261_p2 = scmp.eq.s32.totalorder %s1291_s17, 1  ;;  %p267_p3 = scmp.eq.s32.totalorder %s893_s18, 1 }
   0xe   : > { %p1300_p4 = por %p49_p1, %p48_p0  ;;  %p894_p5 = scmp.ge.s32.totalorder %s1205_s16, 1 }
   0xf   : > { %p1305_p6 = por %p267_p3, %p48_p0  ;;  %p274_p7 = scmp.lt.s32.totalorder %s1205_s16, 3 }
  0x10   : > { %s1504_s1 = sld [smem:[#allocation18_spill]]  ;;  %s1207_s25 = smov [#allocation7]  }
  0x11   : > { %p1313_p8 = pnand %p894_p5, %p274_p7  ;;  %s287_s26 = sshll.u32 %s1207_s25, 4  ;;  %s288_s26 = int_to_ptr.vmem [resolvable:$true] %s287_s26 }
  0x12   : > { %s1507_s4 = sld [smem:[#allocation19_spill]]  ;;  %s1497_s11 = smov 128  }
  0x13   : > { %p939_p9 = pneg %p1313_p8  ;;  %s1498_s12 = smov 8  }
  0x14   : > { %s1210_s18 = smov [#allocation9]   ;;  %s1508_s7 = sld [smem:[#allocation20_spill]] }
  0x15   : > { %p1321_p10 = pnand %p939_p9, %p49_p1  ;;  %s307_s21 = sshll.u32 %s1210_s18, 4  ;;  %s308_s21 = int_to_ptr.vmem [resolvable:$true] %s307_s21 }
  0x16   : > { %s285_s23 = sshll.u32 %s1504_s1, 4  ;;  %s1343_s29 = sadd.s32 1, %s1205_s16   ;;  %s286_s23 = int_to_ptr.hbm [resolvable:$true] %s285_s23 }
  0x17   : > { %942 = dma.hbm_to_vmem [thread:$0]  (!%p1321_p10), %s286_s23, 3072, %s288_s26, [#allocation8], %s1497_s11, %s1497_s11, %s1498_s12  }
  0x18   : > { %s305_s30 = sshll.u32 %s1507_s4, 4  ;;  %s1211_s23 = smov [#allocation10]   ;;  %s306_s30 = int_to_ptr.hbm [resolvable:$true] %s305_s30 }
  0x19   : > { %945 = dma.hbm_to_vmem [thread:$0]  (!%p1321_p10), %s306_s30, 6144, %s308_s21, [#allocation8], %s1497_s11, %s1497_s11, %s1498_s12  }
  0x1a   : > { %s325_s28 = sshll.u32 %s1508_s7, 4  ;;  %s327_s26 = sshll.u32 %s1211_s23, 4  ;;  %s326_s28 = int_to_ptr.hbm [resolvable:$true] %s325_s28  ;;  %s328_s26 = int_to_ptr.vmem [resolvable:$true] %s327_s26 }
  0x1b   : > { %948 = dma.hbm_to_vmem [thread:$0]  (!%p1321_p10), %s326_s28, 1024, %s328_s26, [#allocation11], %s1497_s11, %s1497_s11, %s1498_s12  }
  0x1c   : > { %s32_s18 = ssub.s32 %s1205_s16, %s1343_s29  ;;  %s35_s22 = sadd.s32 1, %s1201_s15 }
  0x1d   : > { %p33_p12 = scmp.eq.s32.totalorder %s32_s18, 0  ;;  %p42_p13 = scmp.ne.s32.totalorder %s1201_s15, %s1197_s14 }
  0x1e   : > { %p43_p0 = scmp.eq.s32.totalorder %s1205_s16, 0  ;;  %p960_p5 = scmp.lt.s32.totalorder %s1205_s16, 2 }
  0x1f   : > { %s1357_s25 = scalar_select %p33_p12, %s1201_s15, %s35_s22  }
  0x20   : > { %p1361_p3 = por %p261_p2, %p42_p13  ;;  %s347_s21 = sand.u32 1, %s1201_s15  }
  0x21   : > { %1509 = sst [smem:[#allocation17_spill]] %s1357_s25  ;;  %s921_s27 = sshll.u32 %s1205_s16, 4 }
  0x22   : > { %p44_p7 = por %p43_p0, %p42_p13  ;;  %s899_s23 = sshll.u32 %s347_s21, 4 }
  0x23   : > { %s356_s28 = scalar_lea.hbm %s1486_s0, %s921_s27  ;;  %s351_s18 = scalar_lea.vmem [#allocation4], %s899_s23 }
  0x24   : > { %s357_s26 = sshll.u32 %s356_s28, 4  ;;  %s359_s11 = sshll.u32 %s351_s18, 4  ;;  %s358_s26 = int_to_ptr.hbm [resolvable:$true] %s357_s26  ;;  %s360_s11 = int_to_ptr.vmem [resolvable:$true] %s359_s11 }
  0x25   : > { %p1371_p9 = pnand %p960_p5, %p44_p7  ;;  %s348_s12 = scalar_lea.sflag [#allocation5], %s347_s21 }
  0x26   : > { %s1101_s7 = sshra.s32 %s358_s26, 4  ;;  %s1108_s27 = scalar_lea.hbm %s1486_s0, 32  ;;  %s1102_s7 = int_to_ptr.hbm [resolvable:$true] %s1101_s7 }
  0x27   : > { %s1103_s25 = scalar_lea.hbm %s1102_s7, 16  ;;  %p1105_p10 = pneg %p1371_p9 }
  0x28   : > { %p1104_p2 = scmp.ne.s32.totalorder %s1102_s7, %s1103_s25  ;;  %p1109_p0 = scmp.lt.s32.totalorder %s1102_s7, %s1486_s0 }
  0x29   : > { %p1110_p5 = scmp.lt.s32.totalorder %s1108_s27, %s1103_s25 }
  0x2a   : > { %p1106_p12 = pnand %p1105_p10, %p1104_p2 }
  0x2b   : > { %p1111_p7 = por %p1110_p5, %p1109_p0 }
  0x2c   : > { %p1107_p13 = pneg %p1106_p12 }
  0x2e   : > { %p1112_p11 = pnand %p1111_p7, %p1107_p13 }
  0x30   : > { %1115 = shalt.err (!%p1112_p11)
}
  0x31   : > { %s1512_s21 = smov 8   ;;  %s1513_s18 = smov 128  }
  0x32   : > { %952 = dma.hbm_to_vmem [thread:$0]  (!%p1371_p9), %s358_s26, 256, %s360_s11, %s348_s12, %s1513_s18, %s1513_s18, %s1512_s21  }
  0x33   : > { %371 = sbr.rel (%p1313_p8) target bundleno = 390 (0x186), region = 60  ;;  %s1391_s1 = sand.u32 (!%p1313_p8), 1, %s1197_s14  }
  0x34   : > { %s903_s7 = sshll.u32 (!%p1313_p8), %s1391_s1, 4  ;;  %s374_s25 = scalar_lea.sflag (!%p1313_p8), [#allocation5], %s1391_s1 }
  0x35   : > { %s1397_s4 = scalar_lea.vmem (!%p1313_p8), [#allocation4], %s903_s7 }
  0x38   : > { %1176 = dma.done.wait (%p1300_p4), %s374_s25, 256  }
  0x39   : > { %1178 = vsyncadd (%p1300_p4), %s374_s25, 4294967040 }
  0x3a   : > { %1180 = dma.done.wait (%p49_p1), [#allocation8], 9216  }
  0x3b   : > { %1182 = vsyncadd (%p49_p1), [#allocation8], 4294958080 }
  0x3c   : > { %1184 = dma.done.wait (%p49_p1), [#allocation11], 1024  }
  0x3d   : > { %1186 = vsyncadd (%p49_p1), [#allocation11], 4294966272  ;;  %vm430_vm0 = vcmask 523264   ;;  %v1212_v0 = vmov 0.0   ;;  %vm433_vm1 = vcmask 517120   ;;  %v459_v1 = vld [vmem:[#allocation7 + $0x78] sm:$0xff] }
  0x3e   : > { %431 = vst.msk [vmem:[#allocation2] sm:$0xff] %vm430_vm0, %v1212_v0  ;;  %v458_v2 = vld [vmem:[#allocation7 + $0x70] sm:$0xff]  ;;  %v528_v3 = vld [vmem:[#allocation7 + $0xb8] sm:$0xff]  ;;  %474 = vmatpush.msra.mxu3 %v459_v1  ;;  %v457_v5 = vld [vmem:[#allocation7 + $0x68] sm:$0xff]  ;;  %s429_s12 = scalar_lea.vmem [#allocation12], %s903_s7  ;;  %s1151_s21 = scalar_lea.hbm %s1496_s10, 32 }
  0x3f   : > { %432 = vst.msk [vmem:[#allocation2 + $0x8] sm:$0xff] %vm430_vm0, %v1212_v0  ;;  %543 = vmatpush.msra.mxu2 %v528_v3  ;;  %v527_v4 = vld [vmem:[#allocation7 + $0xb0] sm:$0xff]  ;;  %v448_v6 = vld [vmem:[#allocation7 + $0x38] sm:$0xff]  ;;  %v526_v7 = vld [vmem:[#allocation7 + $0xa8] sm:$0xff]  ;;  %s788_s26 = sshll.u32 %s429_s12, 4  ;;  %s789_s26 = int_to_ptr.vmem [resolvable:$true] %s788_s26 }
  0x40   : > { %574 = vst [vmem:[#allocation3] sm:$0xff] %v1212_v0  ;;  %475 = vmatpush.msra.mxu3 %v458_v2  ;;  %v447_v8 = vld [vmem:[#allocation7 + $0x30] sm:$0xff]  ;;  %v456_v9 = vld [vmem:[#allocation7 + $0x60] sm:$0xff]  ;;  %503 = vmatpush.msra.mxu1 %v448_v6  ;;  %v446_v11 = vld [vmem:[#allocation7 + $0x28] sm:$0xff] }
  0x41   : > { %575 = vst [vmem:[#allocation3 + $0x8] sm:$0xff] %v1212_v0  ;;  %544 = vmatpush.msra.mxu2 %v527_v4  ;;  %v525_v10 = vld [vmem:[#allocation7 + $0xa0] sm:$0xff]  ;;  %v455_v12 = vld [vmem:[#allocation7 + $0x58] sm:$0xff]  ;;  %v454_v17 = vld [vmem:[#allocation7 + $0x50] sm:$0xff] }
  0x42   : > { %576 = vst [vmem:[#allocation3 + $0x10] sm:$0x3] %v1212_v0  ;;  %476 = vmatpush.msra.mxu3 %v457_v5  ;;  %504 = vmatpush.msra.mxu1 %v447_v8  ;;  %v524_v13 = vld [vmem:[#allocation7 + $0x98] sm:$0xff]  ;;  %v435_v14 = vld [vmem:[%s1397_s4] sm:$0xff]  ;;  %v453_v22 = vld [vmem:[#allocation7 + $0x48] sm:$0xff] }
  0x43   : > { %434 = vst.msk [vmem:[#allocation2 + $0x10] sm:$0x3] %vm433_vm1, %v1212_v0  ;;  %545 = vmatpush.msra.mxu2 %v526_v7  ;;  %v445_v15 = vld [vmem:[#allocation7 + $0x20] sm:$0xff]  ;;  %v436_v16 = vld [vmem:[%s1397_s4 + $0x8] sm:$0xff]  ;;  %v523_v18 = vld [vmem:[#allocation7 + $0x90] sm:$0xff]  ;;  %s922_s4 = sshll.u32 %s1291_s17, 4 }
  0x44   : > { %477 = vmatpush.msra.mxu3 %v456_v9  ;;  %437 = vst.msk [vmem:[#allocation2 + $0x1] sm:$0xff] %vm430_vm0, %v435_v14  ;;  %505 = vmatpush.msra.mxu1 %v446_v11  ;;  %v666_v19 = vld [vmem:[#allocation9 + $0xf8] sm:$0xff]  ;;  %v665_v21 = vld [vmem:[#allocation9 + $0xf0] sm:$0xff]  ;;  %v522_v23 = vld [vmem:[#allocation7 + $0x88] sm:$0xff]  ;;  %s787_s11 = scalar_lea.hbm %s1496_s10, %s922_s4  ;;  %s776_s17 = scalar_lea.sflag [#allocation6], %s1391_s1 }
  0x45   : > { %546 = vmatpush.msra.mxu2 %v525_v10  ;;  %438 = vst.msk [vmem:[#allocation2 + $0x9] sm:$0xff] %vm430_vm0, %v436_v16  ;;  %v444_v20 = vld [vmem:[#allocation7 + $0x18] sm:$0xff]  ;;  %667 = vmatpush.msra.mxu0 %v666_v19  ;;  %v443_v24 = vld [vmem:[#allocation7 + $0x10] sm:$0xff]  ;;  %v664_v25 = vld [vmem:[#allocation9 + $0xe8] sm:$0xff]  ;;  %s790_s22 = sshll.u32 %s787_s11, 4  ;;  %s791_s22 = int_to_ptr.hbm [resolvable:$true] %s790_s22 }
  0x46   : > { %478 = vmatpush.msra.mxu3 %v455_v12  ;;  %506 = vmatpush.msra.mxu1 %v445_v15  ;;  %v452_v26 = vld [vmem:[#allocation7 + $0x40] sm:$0xff]  ;;  %v442_v28 = vld [vmem:[#allocation7 + $0x8] sm:$0xff]  ;;  %v731_v33 = vld [vmem:[#allocation9 + $0x178] sm:$0xff]  ;;  %s1145_s27 = sshra.s32 %s791_s22, 4  ;;  %s1146_s27 = int_to_ptr.hbm [resolvable:$true] %s1145_s27 }
  0x47   : > { %547 = vmatpush.msra.mxu2 %v524_v13  ;;  %v521_v27 = vld [vmem:[#allocation7 + $0x80] sm:$0xff]  ;;  %668 = vmatpush.msra.mxu0 %v665_v21  ;;  %v662_v34 = vld [vmem:[#allocation9 + $0xd8] sm:$0xff]  ;;  %v730_v36 = vld [vmem:[#allocation9 + $0x170] sm:$0xff]  ;;  %s1147_s23 = scalar_lea.hbm %s1146_s27, 16  ;;  %p1152_p11 = scmp.lt.s32.totalorder %s1146_s27, %s1496_s10 }
  0x48   : > { %479 = vmatpush.msra.mxu3 %v454_v17  ;;  %507 = vmatpush.msra.mxu1 %v444_v20  ;;  %v663_v30 = vld [vmem:[#allocation9 + $0xe0] sm:$0xff]  ;;  %v647_v37 = vld [vmem:[#allocation9 + $0x78] sm:$0xff]  ;;  %v661_v38 = vld [vmem:[#allocation9 + $0xd0] sm:$0xff]  ;;  %p1148_p1 = scmp.ne.s32.totalorder %s1146_s27, %s1147_s23  ;;  %p1153_p9 = scmp.lt.s32.totalorder %s1151_s21, %s1147_s23 }
  0x49   : > { %548 = vmatpush.msra.mxu2 %v523_v18  ;;  %669 = vmatpush.msra.mxu0 %v664_v25  ;;  %v441_v32 = vld [vmem:[#allocation7] sm:$0xff]  ;;  %v646_v39 = vld [vmem:[#allocation9 + $0x70] sm:$0xff]  ;;  %v645_v42 = vld [vmem:[#allocation9 + $0x68] sm:$0xff] }
  0x4a   : > { %480 = vmatpush.msra.mxu3 %v453_v22  ;;  %508 = vmatpush.msra.mxu1 %v443_v24  ;;  %v644_v43 = vld [vmem:[#allocation9 + $0x60] sm:$0xff]  ;;  %v643_v45 = vld [vmem:[#allocation9 + $0x58] sm:$0xff]  ;;  %v642_v46 = vld [vmem:[#allocation9 + $0x50] sm:$0xff]  ;;  %p1149_p4 = pnand %p1148_p1, %p1361_p3  ;;  %p1154_p2 = por %p1153_p9, %p1152_p11 }
  0x4b   : > { %549 = vmatpush.msra.mxu2 %v522_v23  ;;  %v1417_v29 = vld [vmem:[#allocation2 + $0x1] sm:$0xff]  ;;  %670 = vmatpush.msra.mxu0 %v663_v30  ;;  %v660_v47 = vld [vmem:[#allocation9 + $0xc8] sm:$0xff]  ;;  %v659_v48 = vld [vmem:[#allocation9 + $0xc0] sm:$0xff] }
  0x4c   : > { %481 = vmatpush.msra.mxu3 %v452_v26  ;;  %v518_v31 = vld [vmem:[#allocation2 + $0x2] sm:$0xff]  ;;  %509 = vmatpush.msra.mxu1 %v442_v28  ;;  %v519_v41 = vld [vmem:[#allocation2 + $0xa] sm:$0xff]  ;;  %v641_v51 = vld [vmem:[#allocation9 + $0x48] sm:$0xff]  ;;  %p1150_p8 = pneg %p1149_p4 }
  0x4d   : > { %550 = vmatpush.msra.mxu2 %v521_v27  ;;  %908 = vmatmul.msk.f32.vlgmr.msra.gmra.mxu3 %vm430_vm0, %v1417_v29  ;;  %v439_v35 = vld [vmem:[#allocation2] sm:$0xff]  ;;  %v1423_v40 = vld [vmem:[#allocation2 + $0x9] sm:$0xff]  ;;  %v729_v52 = vld [vmem:[#allocation9 + $0x168] sm:$0xff] }
  0x4e   : > { %912 = vmatmul.msk.f32.vlgmr.msra.gmra.mxu2 %vm430_vm0, %v518_v31  ;;  %510 = vmatpush.msra.mxu1 %v441_v32  ;;  %v440_v44 = vld [vmem:[#allocation2 + $0x8] sm:$0xff]  ;;  %v657_v50 = vld [vmem:[#allocation9 + $0xb0] sm:$0xff]  ;;  %v656_v53 = vld [vmem:[#allocation9 + $0xa8] sm:$0xff]  ;;  %p1155_p10 = pnand %p1154_p2, %p1150_p8 }
  0x4f   : > { %732 = vmatpush.msrb.mxu2 %v731_v33  ;;  %671 = vmatpush.msra.mxu0 %v662_v34  ;;  %v658_v49 = vld [vmem:[#allocation9 + $0xb8] sm:$0xff]  ;;  %v640_v54 = vld [vmem:[#allocation9 + $0x40] sm:$0xff]  ;;  %v638_v60 = vld [vmem:[#allocation9 + $0x30] sm:$0xff] }
  0x50   : > { %910 = vmatmul.msk.f32.vlgmr.msra.gmra.mxu1 %vm430_vm0, %v439_v35  ;;  %v728_v55 = vld [vmem:[#allocation9 + $0x160] sm:$0xff]  ;;  %v639_v57 = vld [vmem:[#allocation9 + $0x38] sm:$0xff]  ;;  %v726_v61 = vld [vmem:[#allocation9 + $0x150] sm:$0xff] }
  0x51   : > { %733 = vmatpush.msrb.mxu2 %v730_v36  ;;  %690 = vmatpush.msrb.mxu1 %v647_v37  ;;  %v655_v56 = vld [vmem:[#allocation9 + $0xa0] sm:$0xff]  ;;  %v727_v58 = vld [vmem:[#allocation9 + $0x158] sm:$0xff]  ;;  %v653_v62 = vld [vmem:[#allocation9 + $0x90] sm:$0xff] }
  0x52   : > { %672 = vmatpush.msra.mxu0 %v661_v38  ;;  %v654_v59 = vld [vmem:[#allocation9 + $0x98] sm:$0xff]  ;;  %v637_v63 = vld [vmem:[#allocation9 + $0x28] sm:$0xff]  ;;  %v636_v2 = vld [vmem:[#allocation9 + $0x20] sm:$0xff] }
  0x53   : > { %691 = vmatpush.msrb.mxu1 %v646_v39  ;;  %734 = vmatpush.msrb.mxu2 %v729_v52  ;;  %v725_v0 = vld [vmem:[#allocation9 + $0x148] sm:$0xff]  ;;  %v724_v3 = vld [vmem:[#allocation9 + $0x140] sm:$0xff]  ;;  %v635_v5 = vld [vmem:[#allocation9 + $0x18] sm:$0xff] }
  0x54   : > { %673 = vmatpush.msra.mxu0 %v660_v47  ;;  %v652_v1 = vld [vmem:[#allocation9 + $0x88] sm:$0xff]  ;;  %v651_v4 = vld [vmem:[#allocation9 + $0x80] sm:$0xff]  ;;  %v723_v6 = vld [vmem:[#allocation9 + $0x138] sm:$0xff] }
  0x55   : > { %909 = vmatmul.msk.f32.gmra.mxu3 %vm430_vm0, %v1423_v40  ;;  %692 = vmatpush.msrb.mxu1 %v645_v42  ;;  %v588_v7 = vld [vmem:[#allocation10 + $0x38] sm:$0xff]  ;;  %v634_v8 = vld [vmem:[#allocation9 + $0x10] sm:$0xff]  ;;  %v633_v11 = vld [vmem:[#allocation9 + $0x8] sm:$0xff] }
  0x56   : > { %913 = vmatmul.msk.f32.gmra.mxu2 %vm430_vm0, %v519_v41  ;;  %674 = vmatpush.msra.mxu0 %v659_v48  ;;  %v722_v9 = vld [vmem:[#allocation9 + $0x130] sm:$0xff]  ;;  %v721_v12 = vld [vmem:[#allocation9 + $0x128] sm:$0xff]  ;;  %v632_v14 = vld [vmem:[#allocation9] sm:$0xff] }
  0x57   : > { %693 = vmatpush.msrb.mxu1 %v644_v43  ;;  %735 = vmatpush.msrb.mxu2 %v728_v55  ;;  %v587_v10 = vld [vmem:[#allocation10 + $0x30] sm:$0xff]  ;;  %v586_v13 = vld [vmem:[#allocation10 + $0x28] sm:$0xff]  ;;  %v720_v15 = vld [vmem:[#allocation9 + $0x120] sm:$0xff] }
  0x58   : > { %911 = vmatmul.msk.f32.gmra.mxu1 %vm430_vm0, %v440_v44  ;;  %675 = vmatpush.msra.mxu0 %v658_v49  ;;  %v585_v16 = vld [vmem:[#allocation10 + $0x20] sm:$0xff]  ;;  %v719_v17 = vld [vmem:[#allocation9 + $0x118] sm:$0xff]  ;;  %v718_v19 = vld [vmem:[#allocation9 + $0x110] sm:$0xff] }
  0x59   : > { %694 = vmatpush.msrb.mxu1 %v643_v45  ;;  %736 = vmatpush.msrb.mxu2 %v727_v58  ;;  %v584_v18 = vld [vmem:[#allocation10 + $0x18] sm:$0xff]  ;;  %v583_v20 = vld [vmem:[#allocation10 + $0x10] sm:$0xff]  ;;  %v717_v21 = vld [vmem:[#allocation9 + $0x108] sm:$0xff] }
  0x5a   : > { %676 = vmatpush.msra.mxu0 %v657_v50  ;;  %603 = vmatpush.msrb.mxu3 %v588_v7  ;;  %v582_v22 = vld [vmem:[#allocation10 + $0x8] sm:$0xff]  ;;  %v716_v23 = vld [vmem:[#allocation9 + $0x100] sm:$0xff]  ;;  %v1005_v30 = vld [vmem:[%s1488_s2] ss:$0 sm:$0xff] }
  0x5b   : > { %695 = vmatpush.msrb.mxu1 %v642_v46  ;;  %737 = vmatpush.msrb.mxu2 %v726_v61  ;;  %v581_v24 = vld [vmem:[#allocation10] sm:$0xff]  ;;  %v1006_v32 = vld [vmem:[%s1489_s3] ss:$0 sm:$0xff] }
  0x5c   : > { %677 = vmatpush.msra.mxu0 %v656_v53  ;;  %604 = vmatpush.msrb.mxu3 %v587_v10  ;;  %v1009_v49 = vld [vmem:[%s1494_s8] ss:$0 sm:$0xff] }
  0x5d   : > { %696 = vmatpush.msrb.mxu1 %v641_v51  ;;  %738 = vmatpush.msrb.mxu2 %v725_v0  ;;  %v1007_v52 = vld [vmem:[%s1491_s5] ss:$0 sm:$0xff] }
  0x5e   : > { %678 = vmatpush.msra.mxu0 %v655_v56  ;;  %605 = vmatpush.msrb.mxu3 %v586_v13 }
  0x5f   : > { %697 = vmatpush.msrb.mxu1 %v640_v54  ;;  %739 = vmatpush.msrb.mxu2 %v724_v3  ;;  %v1010_v54 = vld [vmem:[%s1495_s9] ss:$0 sm:$0xff] }
  0x60   : > { %679 = vmatpush.msra.mxu0 %v654_v59  ;;  %606 = vmatpush.msrb.mxu3 %v585_v16 }
  0x61   : > { %698 = vmatpush.msrb.mxu1 %v639_v57  ;;  %740 = vmatpush.msrb.mxu2 %v723_v6  ;;  %v1008_v57 = vld [vmem:[%s1492_s6] ss:$0 sm:$0xff] }
  0x62   : > { %680 = vmatpush.msra.mxu0 %v653_v62  ;;  %607 = vmatpush.msrb.mxu3 %v584_v18 }
  0x63   : > { %699 = vmatpush.msrb.mxu1 %v638_v60  ;;  %741 = vmatpush.msrb.mxu2 %v722_v9 }
  0x64   : > { %681 = vmatpush.msra.mxu0 %v652_v1  ;;  %608 = vmatpush.msrb.mxu3 %v583_v20 }
  0x65   : > { %700 = vmatpush.msrb.mxu1 %v637_v63  ;;  %742 = vmatpush.msrb.mxu2 %v721_v12 }
  0x66   : > { %682 = vmatpush.msra.mxu0 %v651_v4  ;;  %609 = vmatpush.msrb.mxu3 %v582_v22 }
  0x67   : > { %701 = vmatpush.msrb.mxu1 %v636_v2  ;;  %743 = vmatpush.msrb.mxu2 %v720_v15 }
  0x68   : > { %610 = vmatpush.msrb.mxu3 %v581_v24 }
  0x69   : > { %702 = vmatpush.msrb.mxu1 %v635_v5  ;;  %744 = vmatpush.msrb.mxu2 %v719_v17 }
  0x6a   : > { %914 = vmatmul.msk.f32.vlgmr.msrb.gmra.mxu3 %vm430_vm0, %v1417_v29 }
  0x6b   : > { %703 = vmatpush.msrb.mxu1 %v634_v8  ;;  %745 = vmatpush.msrb.mxu2 %v718_v19 }
  0x6d   : > { %704 = vmatpush.msrb.mxu1 %v633_v11  ;;  %746 = vmatpush.msrb.mxu2 %v717_v21 }
  0x6f   : > { %705 = vmatpush.msrb.mxu1 %v632_v14  ;;  %747 = vmatpush.msrb.mxu2 %v716_v23 }
  0x72   : > { %915 = vmatmul.msk.f32.gmra.mxu3 %vm430_vm0, %v1423_v40 }
  0xcd   : > { %v512_v25 = vpop.f32.mrf.mxu1 }
  0xd0   : > { %v483_v26 = vpop.f32.mrf.mxu3 }
  0xd1   : > { %v552_v27 = vpop.f32.mrf.mxu2  ;;  %v513_v28 = vadd.f32 %v512_v25, %v483_v26 }
  0xd3   : > { %v558_v31 = vadd.f32 %v552_v27, %v513_v28 }
  0xd5   : > { %v564_v33 = vmul.f32 %v1005_v30, %v558_v31  ;;  %v515_v34 = vpop.f32.mrf.mxu1 }
  0xd7   : > { %v570_v35 = vadd.f32 %v1006_v32, %v564_v33 }
  0xd8   : > { %v486_v29 = vpop.f32.mrf.mxu3 }
  0xd9   : > { %v555_v36 = vpop.f32.mrf.mxu2  ;;  %v572_v37 = vmax.f32 %v570_v35, 0.0  ;;  %v516_v38 = vadd.f32 %v515_v34, %v486_v29 }
  0xdb   : > { %577 = vst [vmem:[#allocation3 + $0x1] sm:$0xff] %v572_v37  ;;  %v559_v39 = vadd.f32 %v555_v36, %v516_v38  ;;  %683 = vmatmul.f32.vlgmr.msra.gmra.mxu0 %v572_v37 }
  0xdd   : > { %v565_v41 = vmul.f32 %v1005_v30, %v559_v39 }
  0xdf   : > { %v571_v42 = vadd.f32 %v1006_v32, %v565_v41 }
  0xe1   : > { %v573_v43 = vmax.f32 %v571_v42, 0.0 }
  0xe2   : > { %v630_v44 = vld [vmem:[#allocation3] sm:$0xff] }
  0xe3   : > { %578 = vst [vmem:[#allocation3 + $0x9] sm:$0xff] %v573_v43  ;;  %706 = vmatmul.f32.vlgmr.msrb.gmra.mxu1 %v630_v44  ;;  %686 = vmatmul.f32.gmra.mxu0 %v573_v43 }
  0xea   : > { %v631_v45 = vld [vmem:[#allocation3 + $0x8] sm:$0xff] }
  0xeb   : > { %v713_v46 = vld [vmem:[#allocation3 + $0x2] sm:$0xff]  ;;  %709 = vmatmul.f32.gmra.mxu1 %v631_v45  ;;  %v714_v40 = vld [vmem:[#allocation3 + $0xa] sm:$0xff] }
  0xec   : > { %748 = vmatmul.f32.vlgmr.msrb.gmra.mxu2 %v713_v46 }
  0xed   : > { %v612_v48 = vpop.f32.mrf.mxu3 }
  0xee   : > { %v622_v53 = vmul.f32 %v1009_v49, %v612_v48 }
  0xf0   : > { %v628_v59 = vadd.f32 %v1010_v54, %v622_v53 }
  0xf4   : > { %751 = vmatmul.f32.gmra.mxu2 %v714_v40 }
  0xf5   : > { %v615_v61 = vpop.f32.mrf.mxu3 }
  0xf6   : > { %v623_v2 = vmul.f32 %v1009_v49, %v615_v61 }
  0xf8   : > { %v629_v7 = vadd.f32 %v1010_v54, %v623_v2 }
 0x158   : > { %v684_v50 = vpop.f32.mrf.mxu0 }
 0x160   : > { %v707_v47 = vpop.f32.mrf.mxu1  ;;  %v687_v63 = vpop.f32.mrf.mxu0 }
 0x161   : > { %v708_v51 = vadd.f32 %v707_v47, %v684_v50 }
 0x168   : > { %v710_v60 = vpop.f32.mrf.mxu1 }
 0x169   : > { %v711_v0 = vadd.f32 %v710_v60, %v687_v63 }
 0x16f   : > { %v749_v55 = vpop.f32.mrf.mxu2 }
 0x170   : > { %v755_v56 = vadd.f32 %v749_v55, %v708_v51 }
 0x172   : > { %v761_v58 = vmul.f32 %v1007_v52, %v755_v56 }
 0x174   : > { %v767_v62 = vadd.f32 %v1008_v57, %v761_v58 }
 0x176   : > { %v769_v1 = vadd.f32 %v767_v62, %v628_v59 }
 0x177   : > { %v752_v3 = vpop.f32.mrf.mxu2 }
 0x178   : > { %v771_v4 = vmax.f32 %v769_v1, 0.0  ;;  %v756_v5 = vadd.f32 %v752_v3, %v711_v0 }
 0x17a   : > { %773 = vst [vmem:[%s429_s12] sm:$0xff] %v771_v4  ;;  %v762_v6 = vmul.f32 %v1007_v52, %v756_v5 }
 0x17c   : > { %v768_v8 = vadd.f32 %v1008_v57, %v762_v6 }
 0x17e   : > { %v770_v9 = vadd.f32 %v768_v8, %v629_v7 }
 0x180   : > { %v772_v10 = vmax.f32 %v770_v9, 0.0 }
 0x182   : > { %774 = vst [vmem:[%s429_s12 + $0x8] sm:$0xff] %v772_v10 }
 0x183   : > { %1158 = shalt.err (!%p1155_p10)
}
 0x184   : > { %s1213_s1 = smov 128   ;;  %s1214_s4 = smov 8  }
 0x185   : > { %937 = dma.vmem_to_hbm [thread:$0]  (%p1361_p3), %s789_s26, 256, %s791_s22, %s776_s17, %s1213_s1, %s1213_s1, %s1214_s4  }
 0x186 PF: > { %s805_s19 = sand.u32 1, %s1193_s13   ;;  %p1514_p12 = scmp.ge.s32.totalorder %s1205_s16, 2 }
 0x187   : > { %s806_s24 = scalar_lea.sflag [#allocation6], %s805_s19 }
 0x188   : > { %p954_p13 = pnand %p1514_p12, %p1305_p6 }
 0x18a   : > { %p955_p0 = pneg %p954_p13 }
 0x18c   : > { %1188 = dma.done.wait (%p955_p0), %s806_s24, 256  }
 0x18d   : > { %1190 = vsyncadd (%p955_p0), %s806_s24, 4294967040  ;;  %s1515_s11 = sld [smem:[#allocation17_spill]]  ;;  %p25_p5 = scmp.ge.s32.totalorder %s1343_s29, 4  }
 0x18e   : > { %s1516_s13 = smov %s1197_s14  ;;  %s1517_s14 = smov %s1201_s15 }
 0x18f   : > { %s1519_s16 = smov %s1343_s29  ;;  %27 = sbr.rel (!%p25_p5) target bundleno = 11 (0xb), region = 121 }
 0x193   : > { %s1518_s15 = smov %s1515_s11 }
 0x194   :  { %812 = vsyncpa [#allocation5], 1 }
 0x195   :  { %814 = vsyncpa [#allocation5 + $0x1], 1 }
 0x196   :  { %815 = vsyncpa [#allocation8], 1 }
 0x197   :  { %816 = vsyncpa [#allocation11], 1 }
 0x198   :  { %817 = vsyncpa [#allocation6], 1 }
 0x199   :  { %819 = vsyncpa [#allocation6 + $0x1], 1 }

</bundles_post_ra>
